<compile_context>
chip_gen: v6e
topology: v6e:2x2x1
jax: 0.10.0
libtpu: 0.0.40
codegen_flags: <defaults>
</compile_context>

<pallas_src>
import functools
import math

import jax
import jax.numpy as jnp
from jax.experimental import pallas as pl
from jax.experimental.pallas import tpu as pltpu

# ---- static network configuration (MyNet3: three smoothed_net heads) ----------------
K = 5                      # conv kernel size
PAD = K // 2               # 'same' padding = 2
N_LAYERS = 5
C = 8                      # n_channels
N_HEADS = 3
SLS = (0, 3, 1)            # smooth_length of convnet / wconvnet / wwconvnet
KKC = K * K * C            # 200: im2col rows for an 8-channel activation
PXROWS = 32                # 25 image taps padded to 32 sublanes


# ----------------------------- activations (kernel + reference) -----------------------

def _leaky(v):                                    # nn.LeakyReLU(negative_slope=0.2)
    return jnp.where(v > 0, v, 0.2 * v)


def _silu(v):                                     # nn.SiLU = x * sigmoid(x)
    return v * (1.0 / (1.0 + jnp.exp(-v)))


# --------------------------- pltpu.roll sign-convention probe -------------------------

def _roll_probe_kernel(x_ref, o_ref):
    o_ref[...] = pltpu.roll(x_ref[...], 1, axis=1)


def _roll_matches_jnp():
    """Detect (once, at build time) whether pltpu.roll follows jnp.roll semantics."""
    x = jnp.broadcast_to(jnp.arange(128, dtype=jnp.float32), (8, 128))
    out = pl.pallas_call(
        _roll_probe_kernel,
        out_shape=jax.ShapeDtypeStruct((8, 128), jnp.float32))(x)
    # jnp.roll semantics: out[i] = x[(i - shift) % n]  =>  out[0, 0] == 127
    return bool(out[0, 0] == 127.0)


def _lane_shift(v, off, n, roll_like_jnp):
    """result[..., q] = v[..., (q + off) % n] for a static offset (one XLU lane rotate)."""
    if off % n == 0:
        return v
    s = (-off) % n if roll_like_jnp else off % n
    return pltpu.roll(v, s, axis=1)


# ----------------------------------- im2col builders ----------------------------------

def _fill_im2col(dst_ref, base, z, wp, n, roll_like_jnp):
    """dst_ref[base + tap*C + c, :] = z[c, :] shifted by off(tap).

    Wrapped lanes only land in halo / pad columns; every consumer is masked by
    `interior`, so 'same' zero-padding semantics are preserved."""
    rows = z.shape[0]
    for dy in range(K):
        for dx in range(K):
            tap = dy * K + dx
            off = (dy - PAD) * wp + (dx - PAD)
            r0 = base + tap * rows
            dst_ref[r0:r0 + rows, :] = _lane_shift(z, off, n, roll_like_jnp)


def _fill_im2col_image(px_ref, xrow, wp, n, roll_like_jnp):
    """Compact im2col of the (zero-haloed) 1-channel image: one row per tap (25 rows)."""
    xb = jnp.broadcast_to(xrow, (C, n))           # hoisted broadcast (same vreg count)
    for dy in range(K):
        for dx in range(K):
            tap = dy * K + dx
            off = (dy - PAD) * wp + (dx - PAD)
            px_ref[tap:tap + 1, :] = _lane_shift(xb, off, n, roll_like_jnp)[0:1, :]


# ----------------------------------------- kernel -------------------------------------

def mynet3_kernel(wp, npix_pad, roll_like_jnp,
                  x_ref, wximg_ref, bx_ref, wz_ref, wfirst_ref, wzx_ref,
                  eff_ref, mask_ref, o_ref, px_ref, pzz_ref):
    """One batch element per grid step; sums the energies of the three heads."""
    interior = mask_ref[...]                      # (C, NPIX): 1 inside image, 0 elsewhere

    # Compact im2col of the input image; unused rows 25..31 zeroed (stale VMEM guard).
    px_ref[K * K:PXROWS, :] = jnp.zeros((PXROWS - K * K, npix_pad), jnp.float32)
    _fill_im2col_image(px_ref, x_ref[0], wp, npix_pad, roll_like_jnp)

    total = jnp.zeros((), jnp.float32)
    for h, sl in enumerate(SLS):                  # statically unrolled per-head structure
        # z = act(wxs[0](x))
        pre = jnp.dot(wximg_ref[h, 0], px_ref[...],
                      preferred_element_type=jnp.float32) + bx_ref[h, 0]
        z = (_leaky(pre) if sl == 0 else _silu(pre)) * interior          # zero halo/pad

        for i in range(N_LAYERS):
            if sl == 0 or i < sl - 1:
                # z = act(wzs[i](z) + wxs[i+1](x))  -- x branch uses the compact px.
                _fill_im2col(pzz_ref, 0, z, wp, npix_pad, roll_like_jnp)
                pre = (jnp.dot(wz_ref[h, i], pzz_ref[0:KKC, :],
                               preferred_element_type=jnp.float32)
                       + jnp.dot(wximg_ref[h, i + 1], px_ref[...],
                                 preferred_element_type=jnp.float32)
                       + bx_ref[h, i + 1])
            elif i == sl - 1:
                # Here z IS z_sm: snapshot im2col(z_sm) into the upper half and use the
                # pre-summed (wzs[i] + wxs[i+1]) weights -> a single dot.
                _fill_im2col(pzz_ref, KKC, z, wp, npix_pad, roll_like_jnp)
                pre = (jnp.dot(wfirst_ref[h], pzz_ref[KKC:2 * KKC, :],
                               preferred_element_type=jnp.float32)
                       + bx_ref[h, i + 1])
            else:
                # z = act(wzs[i](z) + wxs[i+1](z_sm)): one fused dot over the stacked
                # [im2col(z); im2col(z_sm)] buffer with [wz | wx] weights.
                _fill_im2col(pzz_ref, 0, z, wp, npix_pad, roll_like_jnp)
                pre = (jnp.dot(wzx_ref[h, i], pzz_ref[...],
                               preferred_element_type=jnp.float32)
                       + bx_ref[h, i + 1])
            z = (_silu(pre) if i < sl - 1 else _leaky(pre)) * interior   # zero halo/pad

        # final 8->1 conv + masked spatial mean, folded into the precomputed E[h].
        total = total + jnp.sum(z * eff_ref[h])

    o_ref[...] = total.reshape(1, 1, 1)


# ------------------------------ parameters / packing -----------------------------------

def init_head_params(key, smooth_length):
    """Deterministic synthetic init mirroring smoothed_net's layer shapes & init."""
    if smooth_length == 0:
        cins = [1] * (N_LAYERS + 1)
    else:
        cins = [1] * smooth_length + [C] * (N_LAYERS + 1 - smooth_length)
    keys = jax.random.split(key, 2 * (N_LAYERS + 1) + N_LAYERS + 1)
    ki = 0
    wxs_w, wxs_b = [], []
    for cin in cins:                                   # PyTorch Conv2d default init range
        bound = 1.0 / math.sqrt(cin * K * K)
        wxs_w.append(jax.random.uniform(keys[ki], (K, K, cin, C), jnp.float32,
                                        -bound, bound)); ki += 1
        wxs_b.append(jax.random.uniform(keys[ki], (C,), jnp.float32,
                                        -bound, bound)); ki += 1
    wzs_w = []
    for _ in range(N_LAYERS):                          # initialize_weights(): U(0, 0.001)
        wzs_w.append(jax.random.uniform(keys[ki], (K, K, C, C), jnp.float32,
                                        0.0, 0.001)); ki += 1
    final_w = jax.random.uniform(keys[ki], (K, K, C, 1), jnp.float32, 0.0, 0.001)
    return dict(wxs_w=wxs_w, wxs_b=wxs_b, wzs_w=wzs_w, final_w=final_w)


def clamp_head(p, sl):
    """args.wclip: clamp wzs[sl:] and the final conv to >= 0 (forward-time op in torch)."""
    return dict(
        wxs_w=p["wxs_w"], wxs_b=p["wxs_b"],
        wzs_w=[jnp.maximum(w, 0.0) if i >= sl else w for i, w in enumerate(p["wzs_w"])],
        final_w=jnp.maximum(p["final_w"], 0.0))


def _flat_hwio(w):
    """(K,K,cin,cout) HWIO -> (cout, K*K*cin); row index = tap*cin + ci (im2col layout)."""
    return jnp.transpose(w, (3, 0, 1, 2)).reshape(w.shape[3], -1)


def pack_params(heads, h_img, w_img, npix_pad):
    hp, wp = h_img + 2 * PAD, w_img + 2 * PAD
    npix = hp * wp
    wximg = jnp.zeros((N_HEADS, N_LAYERS + 1, C, PXROWS), jnp.float32)
    bx = jnp.zeros((N_HEADS, N_LAYERS + 1, C, 1), jnp.float32)
    wz = jnp.zeros((N_HEADS, N_LAYERS, C, KKC), jnp.float32)
    wfirst = jnp.zeros((N_HEADS, C, KKC), jnp.float32)
    wzx = jnp.zeros((N_HEADS, N_LAYERS, C, 2 * KKC), jnp.float32)
    eff = jnp.zeros((N_HEADS, C, npix_pad), jnp.float32)
    for h, (p0, sl) in enumerate(zip(heads, SLS)):
        p = clamp_head(p0, sl)
        wx_mats = []
        for j, (w, b) in enumerate(zip(p["wxs_w"], p["wxs_b"])):
            bx = bx.at[h, j].set(b.reshape(C, 1))
            if w.shape[2] == 1:                        # image-sourced: compact 25-tap rows
                wximg = wximg.at[h, j, :, :K * K].set(_flat_hwio(w))
                wx_mats.append(None)
            else:                                      # z_sm-sourced: full 200-row layout
                wx_mats.append(_flat_hwio(w))
        wz_mats = [_flat_hwio(w) for w in p["wzs_w"]]
        for i in range(N_LAYERS):
            if sl == 0 or i < sl - 1:
                wz = wz.at[h, i].set(wz_mats[i])
            elif i == sl - 1:                          # z == z_sm: pre-sum the two convs
                wfirst = wfirst.at[h].set(wz_mats[i] + wx_mats[i + 1])
            else:                                      # fused [wz | wx] for one MXU dot
                wzx = wzx.at[h, i].set(
                    jnp.concatenate([wz_mats[i], wx_mats[i + 1]], axis=1))
        # E[h][c, q] = sum_tap final_w[tap, c] * 1[q - off(tap) inside image] / (H*W):
        # folds the final 8->1 conv, interior mask and spatial mean into one mask.
        e = jnp.zeros((C, hp, wp), jnp.float32)
        fw = p["final_w"]                              # (K, K, C, 1)
        for dy in range(K):
            for dx in range(K):
                sh = jnp.zeros((hp, wp), jnp.float32).at[
                    dy:dy + h_img, dx:dx + w_img].set(1.0)
                e = e + fw[dy, dx, :, 0][:, None, None] * sh[None]
        eff = eff.at[h, :, :npix].set(e.reshape(C, npix) / float(h_img * w_img))
    return wximg, bx, wz, wfirst, wzx, eff


# --------------------------------- forward wrapper -------------------------------------

def make_mynet3(h_img=16, w_img=16):
    hp, wp = h_img + 2 * PAD, w_img + 2 * PAD
    npix = hp * wp
    npix_pad = ((npix + 127) // 128) * 128             # 400 -> 512: lane-dense spatial axis

    key = jax.random.PRNGKey(0)
    heads = [init_head_params(k, sl)
             for k, sl in zip(jax.random.split(key, N_HEADS), SLS)]
    wximg, bx, wz, wfirst, wzx, eff = pack_params(heads, h_img, w_img, npix_pad)

    mask2d = jnp.zeros((hp, wp), jnp.float32).at[PAD:PAD + h_img, PAD:PAD + w_img].set(1.0)
    mask = jnp.zeros((C, npix_pad), jnp.float32).at[:, :npix].set(
        jnp.broadcast_to(mask2d.reshape(1, npix), (C, npix)))

    roll_like_jnp = _roll_matches_jnp()
    kernel = functools.partial(mynet3_kernel, wp, npix_pad, roll_like_jnp)

    @jax.jit
    def forward(image_nchw):                           # (B, 1, H, W) NCHW, like PyTorch
        b = image_nchw.shape[0]
        x = image_nchw.astype(jnp.float32)
        # single tiny pad of the network input; intermediate halos handled in-kernel
        xp = jnp.pad(x, ((0, 0), (0, 0), (PAD, PAD), (PAD, PAD)))
        xf = jnp.zeros((b, 1, npix_pad), jnp.float32).at[:, :, :npix].set(
            xp.reshape(b, 1, npix))
        out = pl.pallas_call(
            kernel,
            out_shape=jax.ShapeDtypeStruct((b, 1, 1), jnp.float32),
            grid=(b,),
            in_specs=[
                pl.BlockSpec((1, 1, npix_pad), lambda i: (i, 0, 0)),
                pl.BlockSpec((N_HEADS, N_LAYERS + 1, C, PXROWS), lambda i: (0, 0, 0, 0)),
                pl.BlockSpec((N_HEADS, N_LAYERS + 1, C, 1), lambda i: (0, 0, 0, 0)),
                pl.BlockSpec((N_HEADS, N_LAYERS, C, KKC), lambda i: (0, 0, 0, 0)),
                pl.BlockSpec((N_HEADS, C, KKC), lambda i: (0, 0, 0)),
                pl.BlockSpec((N_HEADS, N_LAYERS, C, 2 * KKC), lambda i: (0, 0, 0, 0)),
                pl.BlockSpec((N_HEADS, C, npix_pad), lambda i: (0, 0, 0)),
                pl.BlockSpec((C, npix_pad), lambda i: (0, 0)),
            ],
            out_specs=pl.BlockSpec((1, 1, 1), lambda i: (i, 0, 0)),
            scratch_shapes=[
                pltpu.VMEM((PXROWS, npix_pad), jnp.float32),    # compact im2col(x)
                pltpu.VMEM((2 * KKC, npix_pad), jnp.float32),   # [im2col(z); im2col(z_sm)]
            ],
            compiler_params=pltpu.CompilerParams(
                dimension_semantics=("parallel",)),             # megacore over batch (v7x)
        )(xf, wximg, bx, wz, wfirst, wzx, eff, mask)
        return out.reshape(b, 1)

    return forward, heads


# ------------------------------- pure-JAX reference ------------------------------------

def _conv_ref(x, w, b=None):
    y = jax.lax.conv_general_dilated(
        x, w, window_strides=(1, 1), padding="SAME",
        dimension_numbers=("NCHW", "HWIO", "NCHW"),
        precision=jax.lax.Precision.HIGHEST)
    if b is not None:
        y = y + b.reshape(1, -1, 1, 1)
    return y


def mynet3_reference(heads, image):
    """Pure-JAX (lax.conv) re-implementation of the PyTorch MyNet3 forward."""
    x = image.astype(jnp.float32)
    total = jnp.zeros((x.shape[0], 1), jnp.float32)
    for p0, sl in zip(heads, SLS):
        p = clamp_head(p0, sl)
        if sl == 0:
            z = _leaky(_conv_ref(x, p["wxs_w"][0], p["wxs_b"][0])); z_sm = x
        else:
            z = _silu(_conv_ref(x, p["wxs_w"][0], p["wxs_b"][0])); z_sm = z
        for i in range(N_LAYERS):
            src = x if i < sl - 1 else z_sm
            pre = (_conv_ref(z, p["wzs_w"][i])
                   + _conv_ref(src, p["wxs_w"][i + 1], p["wxs_b"][i + 1]))
            if i < sl - 1:
                z = _silu(pre); z_sm = z
            else:
                z = _leaky(pre)
        zf = _conv_ref(z, p["final_w"])
        total = total + zf.reshape(zf.shape[0], -1).mean(axis=1, keepdims=True)
    return total


# -------------------------------------- main --------------------------------------------

if __name__ == "__main__":
    B, Himg, Wimg = 2, 16, 16
    image = jax.random.normal(jax.random.PRNGKey(0), (B, 1, Himg, Wimg), jnp.float32)
    fwd, heads = make_mynet3(Himg, Wimg)
    out = fwd(image)
    jax.block_until_ready(out)
    assert out.shape == (B, 1), out.shape
    assert bool(jnp.all(jnp.isfinite(out)))
    ref = mynet3_reference(heads, image)
    assert jnp.allclose(out, ref, rtol=5e-3, atol=1e-6), (out, ref)
    print("KERNEL_OK")
</pallas_src>

<mosaic_0001>
module attributes {stable_mosaic.version = 11 : i64} {
  func.func @_roll_probe_kernel(%arg0: memref<8x128xf32, #tpu.memory_space<vmem>>, %arg1: memref<8x128xf32, #tpu.memory_space<vmem>>) attributes {dimension_semantics = [], scalar_prefetch = 0 : i64, scratch_operands = 0 : i64, tpu.core_type = #tpu.core_type<tc>} {
    %c0 = arith.constant 0 : index
    %c0_0 = arith.constant 0 : index
    %0 = vector.load %arg0[%c0, %c0_0] : memref<8x128xf32, #tpu.memory_space<vmem>>, vector<8x128xf32>
    %c1_i32 = arith.constant 1 : i32
    %1 = tpu.dynamic_rotate %0 by %c1_i32 dim 1 : vector<8x128xf32>, i32 -> vector<8x128xf32>
    %c0_1 = arith.constant 0 : index
    %c0_2 = arith.constant 0 : index
    %2 = vector.load %arg1[%c0_1, %c0_2] : memref<8x128xf32, #tpu.memory_space<vmem>>, vector<8x128xf32>
    tpu.vector_store %arg1[%c0_1, %c0_2], %1 {strides = array<i32>} : memref<8x128xf32, #tpu.memory_space<vmem>>, vector<8x128xf32>,
    return
  }
}

</mosaic_0001>

<bundles_post_ra>
// kernel: tpu_custom_call.1
= control target key start
LH: loop header
LB: loop body
LE: loop exit
PB: predicated region body
PF: predicated region fallthrough
CT: control target
= control target key end

     0   :  { %6 = vsyncpa [#allocation3], 0  ;;  %s106_s0 = inlined_call_operand.hbm [shape: f32[8,128], index: 0, kind: input, shape index: {}]   ;;  %s107_s1 = inlined_call_operand.hbm [shape: f32[8,128], index: 1, kind: output, shape index: {}]  }
   0x1   :  { %7 = vsyncpa [#allocation4], 0  ;;  %s87_s6 = smov [#allocation2]  }
   0x2   :  { %s14_s7 = sshll.u32 %s87_s6, 4  ;;  %s15_s7 = int_to_ptr.vmem [resolvable:$true] %s14_s7 }
   0x3   :  { %s51_s8 = scalar_lea.vmem %s15_s7, 128  ;;  %p56_p1 = scmp.lt.s32.totalorder %s15_s7, %s15_s7 }
   0x4   :  { %p52_p0 = scmp.ne.s32.totalorder %s15_s7, %s51_s8  ;;  %p57_p2 = scmp.lt.s32.totalorder %s51_s8, %s51_s8 }
   0x6   :  { %p58_p3 = por %p57_p2, %p56_p1 }
   0x8   :  { %p59_p4 = pnand %p58_p3, %p52_p0 }
   0xa   :  { %62 = shalt.err (!%p59_p4)
}
   0xb   :  { %17 = dma.hbm_to_vmem [thread:$0]  %s106_s0, 128, %s15_s7, [#allocation3]  }
   0xc   :  { %83 = dma.done.wait [#allocation3], 128  }
   0xd   :  { %84 = vsyncadd [#allocation3], 4294967168  ;;  %v21_v0 = vld [vmem:[#allocation2] sm:$0xff]  ;;  %s88_s11 = smov 1   ;;  %s89_s12 = smov [#allocation5]  }
   0xe   :  { %22 = vrot.lane.b32.xlu0 %v21_v0, %s88_s11  ;;  %s31_s13 = sshll.u32 %s89_s12, 4  ;;  %s32_s13 = int_to_ptr.vmem [resolvable:$true] %s31_s13 }
   0xf   :  { %s63_s14 = scalar_lea.vmem %s32_s13, 128  ;;  %p68_p6 = scmp.lt.s32.totalorder %s32_s13, %s32_s13 }
  0x10   :  { %p64_p5 = scmp.ne.s32.totalorder %s32_s13, %s63_s14  ;;  %p69_p7 = scmp.lt.s32.totalorder %s63_s14, %s63_s14 }
  0x12   :  { %p70_p8 = por %p69_p7, %p68_p6 }
  0x14   :  { %p71_p9 = pnand %p70_p8, %p64_p5 }
  0x80   :  { %v23_v1 = vpop.permute.xlu0 %22 }
  0x81   :  { %24 = vst [vmem:[#allocation5] sm:$0xff] %v23_v1 }
  0x82   :  { %74 = shalt.err (!%p71_p9)
}
  0x83   :  { %34 = dma.vmem_to_hbm [thread:$0]  %s32_s13, 128, %s107_s1, [#allocation4]  }
  0x84   :  { %85 = dma.done.wait [#allocation4], 128  }
  0x85   :  { %86 = vsyncadd [#allocation4], 4294967168 }
  0x86   :  { %38 = vsyncpa [#allocation3], 1 }
  0x87   :  { %39 = vsyncpa [#allocation4], 1 }

</bundles_post_ra>
